<compile_context>
chip_gen: v5e
topology: v5e:2x2
jax: 0.10.0
libtpu: 0.0.40
codegen_flags: <defaults>
</compile_context>

<pallas_src>
import functools
import math

import jax
import jax.numpy as jnp
from jax.experimental import pallas as pl
from jax.experimental.pallas import tpu as pltpu

EPS = 1e-5


def _layernorm(v, w, b):
    mu = jnp.mean(v, axis=-1, keepdims=True)
    var = jnp.mean((v - mu) ** 2, axis=-1, keepdims=True)
    return (v - mu) * jax.lax.rsqrt(var + EPS) * w + b


def _gelu_exact(x):
    # PyTorch nn.GELU() default = exact erf formulation.
    return 0.5 * x * (1.0 + jax.lax.erf(x * (1.0 / math.sqrt(2.0))))


# ---------------------------------------------------------------------------
# Kernel 1: LN1 + Q/K/V projections (once per sequence tile, bf16 outputs).
# ---------------------------------------------------------------------------
def qkv_proj_kernel(x_ref, ln1w_ref, ln1b_ref, wq_ref, wk_ref, wv_ref,
                    q_ref, k_ref, v_ref, *, inv_sqrt_dh):
    x = x_ref[0].astype(jnp.float32)                      # (TS, C)
    h = _layernorm(x, ln1w_ref[...], ln1b_ref[...])
    hb = h.astype(jnp.bfloat16)
    # bf16 operands, fp32 MXU accumulation; softmax 1/sqrt(dh) folded into q.
    q = jnp.dot(hb, wq_ref[...], preferred_element_type=jnp.float32) * inv_sqrt_dh
    k = jnp.dot(hb, wk_ref[...], preferred_element_type=jnp.float32)
    v = jnp.dot(hb, wv_ref[...], preferred_element_type=jnp.float32)
    q_ref[0] = q.astype(q_ref.dtype)
    k_ref[0] = k.astype(k_ref.dtype)
    v_ref[0] = v.astype(v_ref.dtype)


# ---------------------------------------------------------------------------
# Kernel 2: flash attention (KV tiled, online softmax) + out-proj + residual
#           + LN2 + MLP(GELU) + residual.
# ---------------------------------------------------------------------------
def attn_mlp_kernel(xq_ref, q_ref, k_ref, v_ref,
                    wo_ref, ln2w_ref, ln2b_ref,
                    w1_ref, b1_ref, w2_ref, b2_ref,
                    o_ref,
                    m_sc, l_sc, acc_sc,
                    *, n_heads, head_dim, add_residual2):
    kv = pl.program_id(2)
    C = n_heads * head_dim
    TQ = q_ref.shape[1]
    TK = k_ref.shape[1]

    @pl.when(kv == 0)
    def _():
        m_sc[...] = jnp.full(m_sc.shape, -jnp.inf, m_sc.dtype)
        l_sc[...] = jnp.zeros(l_sc.shape, l_sc.dtype)
        acc_sc[...] = jnp.zeros(acc_sc.shape, acc_sc.dtype)

    qh = q_ref[0].reshape(TQ, n_heads, head_dim)          # bf16, scale pre-folded
    kh = k_ref[0].reshape(TK, n_heads, head_dim)
    vh = v_ref[0].reshape(TK, n_heads, head_dim)

    # Batched over heads; bf16 operands, fp32 accumulation.
    s = jnp.einsum("qhd,khd->hqk", qh, kh,
                   preferred_element_type=jnp.float32)    # (H, TQ, TK)

    m_prev = m_sc[...]
    m_new = jnp.maximum(m_prev, jnp.max(s, axis=-1, keepdims=True))
    alpha = jnp.exp(m_prev - m_new)
    p = jnp.exp(s - m_new)
    l_sc[...] = alpha * l_sc[...] + jnp.sum(p, axis=-1, keepdims=True)
    acc_sc[...] = alpha * acc_sc[...] + jnp.einsum(
        "hqk,khd->hqd", p.astype(jnp.bfloat16), vh,
        preferred_element_type=jnp.float32)               # (H, TQ, dh)
    m_sc[...] = m_new

    # TODO(synk): attention dropout (p=0.1) not applied — inference/eval mode.

    @pl.when(kv == pl.num_programs(2) - 1)
    def _():
        o = acc_sc[...] * pl.reciprocal(l_sc[...], approx=True)   # (H, TQ, dh)
        o = jnp.transpose(o, (1, 0, 2)).reshape(TQ, C)            # (TQ, C)
        attn = jnp.dot(o.astype(jnp.bfloat16), wo_ref[...],
                       preferred_element_type=jnp.float32)
        x1 = xq_ref[0].astype(jnp.float32) + attn                 # residual 1

        h2 = _layernorm(x1, ln2w_ref[...], ln2b_ref[...])
        m1 = jnp.dot(h2.astype(jnp.bfloat16), w1_ref[...],
                     preferred_element_type=jnp.float32) + b1_ref[...]
        g = _gelu_exact(m1)
        m2 = jnp.dot(g.astype(jnp.bfloat16), w2_ref[...],
                     preferred_element_type=jnp.float32) + b2_ref[...]
        if add_residual2:
            o_ref[0] = (x1 + m2).astype(o_ref.dtype)              # residual 2
        else:
            o_ref[0] = m2.astype(o_ref.dtype)


# ---------------------------------------------------------------------------
# Tiling / VMEM helpers (generation aware).
# ---------------------------------------------------------------------------
def _pick_tile(S, prefs):
    for t in prefs:
        if S % t == 0:
            return t
    return S  # ragged S: single full-extent tile (block dim == array dim is legal)


def _pick_q_tile(S):
    try:
        kind = jax.devices()[0].device_kind.lower()
    except Exception:
        kind = ""
    # v5-class chips: 128-deep MXU rows -> prefer TQ=128; v6e/v7x prefer 256.
    prefs = (128, 256, 64, 32, 16, 8) if "v5" in kind else (256, 128, 64, 32, 16, 8)
    return _pick_tile(S, prefs)


def _vmem_limit_bytes(needed):
    phys = 64 << 20  # conservative default (v7x-sized) if the query fails
    try:
        phys = int(getattr(pltpu.get_tpu_info(), "vmem_capacity_bytes", phys))
    except Exception:
        pass
    if phys >= (128 << 20):
        cap = 100 << 20                          # v5e / v6e: 128 MiB physical
    else:
        cap = max(phys - (12 << 20), 32 << 20)   # v7x: leave compiler headroom
    return int(max(32 << 20, min(cap, needed + (8 << 20))))


# ---------------------------------------------------------------------------
# Wrapper.
# ---------------------------------------------------------------------------
def _forward(x, params, n_heads, *, single_buffer_weights):
    B, S, C = x.shape
    dh = C // n_heads
    mid = params["w1"].shape[1]
    C_out = params["w2"].shape[1]
    add_res2 = (C_out == C)
    bf16 = jnp.bfloat16

    # bf16 weights: native MXU rate, half the VMEM footprint. LN/biases fp32.
    wq = params["wq"].astype(bf16)
    wk = params["wk"].astype(bf16)
    wv = params["wv"].astype(bf16)
    wo = params["wo"].astype(bf16)
    w1 = params["w1"].astype(bf16)
    w2 = params["w2"].astype(bf16)

    # Grid-invariant operands: single-buffer them (they never change block).
    wmode = pl.Buffered(1) if single_buffer_weights else None

    def const_spec(shape):
        if wmode is None:
            return pl.BlockSpec(shape, lambda *_: (0, 0))
        return pl.BlockSpec(shape, lambda *_: (0, 0), pipeline_mode=wmode)

    wbuf = 1 if single_buffer_weights else 2

    # ----------------- kernel 1: LN1 + QKV projection ----------------------
    TS = _pick_tile(S, (256, 128, 64, 32, 16, 8))
    ns = S // TS

    proj_need = (2 * TS * C * 4                      # x tile (fp32, dbl-buffered)
                 + 3 * 2 * TS * C * 2                # q/k/v tiles (bf16, dbl-buffered)
                 + wbuf * (3 * C * C * 2 + 2 * C * 4)  # weights + LN params
                 + 6 * TS * C * 4)                   # fp32 intermediates
    proj_cost = pl.CostEstimate(
        flops=int(6 * B * S * C * C),
        transcendentals=int(B * S),
        bytes_accessed=int(B * S * C * 4 + 3 * B * S * C * 2 + 3 * C * C * 2),
    )

    q, k, v = pl.pallas_call(
        functools.partial(qkv_proj_kernel, inv_sqrt_dh=1.0 / math.sqrt(dh)),
        out_shape=(jax.ShapeDtypeStruct((B, S, C), bf16),) * 3,
        grid_spec=pltpu.PrefetchScalarGridSpec(
            num_scalar_prefetch=0,
            grid=(B, ns),
            in_specs=[
                pl.BlockSpec((1, TS, C), lambda b, si: (b, si, 0)),   # x seq tile
                const_spec((1, C)), const_spec((1, C)),               # ln1 w, b
                const_spec((C, C)), const_spec((C, C)), const_spec((C, C)),  # Wq Wk Wv
            ],
            out_specs=[pl.BlockSpec((1, TS, C), lambda b, si: (b, si, 0))] * 3,
        ),
        compiler_params=pltpu.CompilerParams(
            dimension_semantics=("parallel", "parallel"),
            vmem_limit_bytes=_vmem_limit_bytes(proj_need),
        ),
        cost_estimate=proj_cost,
    )(x, params["ln1_w"], params["ln1_b"], wq, wk, wv)

    # --------- kernel 2: flash attention + out-proj + LN2 + MLP ------------
    TQ = _pick_q_tile(S)
    TK = _pick_tile(S, (256, 128, 64, 32, 16, 8))
    nq, nk = S // TQ, S // TK

    attn_need = (2 * TQ * C * 4                      # x query tile (fp32 residual)
                 + 2 * TQ * C * 2                    # q (bf16)
                 + 2 * 2 * TK * C * 2                # k, v (bf16, dbl-buffered)
                 + 2 * TQ * C_out * 4                # output tile
                 + wbuf * 2 * (C * C + C * mid + mid * C_out)   # bf16 weights
                 + 4 * (2 * n_heads * TQ * TK        # s and p (fp32)
                        + n_heads * TQ * (dh + 2)    # acc / m / l scratch
                        + TQ * mid + 4 * TQ * C))    # MLP + misc fp32 temps
    flops = (B * nq * nk * 4 * TQ * TK * C
             + B * nq * (2 * TQ * C * C + 2 * TQ * C * mid + 2 * TQ * mid * C_out))
    attn_cost = pl.CostEstimate(
        flops=int(flops),
        transcendentals=int(B * nq * nk * n_heads * TQ * TK + B * nq * TQ * mid),
        bytes_accessed=int(B * S * C * 4 + B * S * C * 2 + 2 * B * nq * S * C * 2
                           + B * S * C_out * 4
                           + 2 * (C * C + C * mid + mid * C_out)),
    )

    kernel = functools.partial(attn_mlp_kernel, n_heads=n_heads,
                               head_dim=dh, add_residual2=add_res2)
    return pl.pallas_call(
        kernel,
        out_shape=jax.ShapeDtypeStruct((B, S, C_out), x.dtype),
        grid_spec=pltpu.PrefetchScalarGridSpec(
            num_scalar_prefetch=0,
            grid=(B, nq, nk),
            in_specs=[
                pl.BlockSpec((1, TQ, C), lambda b, qi, ki: (b, qi, 0)),  # x (residual)
                pl.BlockSpec((1, TQ, C), lambda b, qi, ki: (b, qi, 0)),  # q
                pl.BlockSpec((1, TK, C), lambda b, qi, ki: (b, ki, 0)),  # k
                pl.BlockSpec((1, TK, C), lambda b, qi, ki: (b, ki, 0)),  # v
                const_spec((C, C)),                                      # Wo
                const_spec((1, C)), const_spec((1, C)),                  # ln2 w, b
                const_spec((C, mid)), const_spec((1, mid)),              # W1, b1
                const_spec((mid, C_out)), const_spec((1, C_out)),        # W2, b2
            ],
            out_specs=pl.BlockSpec((1, TQ, C_out), lambda b, qi, ki: (b, qi, 0)),
            scratch_shapes=[
                pltpu.VMEM((n_heads, TQ, 1), jnp.float32),   # running max
                pltpu.VMEM((n_heads, TQ, 1), jnp.float32),   # running sum
                pltpu.VMEM((n_heads, TQ, dh), jnp.float32),  # unnormalized acc
            ],
        ),
        compiler_params=pltpu.CompilerParams(
            dimension_semantics=("parallel", "parallel", "arbitrary"),
            vmem_limit_bytes=_vmem_limit_bytes(attn_need),
        ),
        cost_estimate=attn_cost,
    )(x, q, k, v, wo, params["ln2_w"], params["ln2_b"],
      w1, params["b1"], w2, params["b2"])


def transformer_block_self(x, params, n_heads):
    try:
        return _forward(x, params, n_heads, single_buffer_weights=True)
    except Exception:
        # pipeline_mode=pl.Buffered(1) unsupported on this jax build; fall back
        # to default double-buffered weight operands (identical math).
        return _forward(x, params, n_heads, single_buffer_weights=False)


# ---------------- pure-JAX fp32 reference (mirrors the PyTorch module) ------
def reference(x, params, n_heads):
    B, S, C = x.shape
    dh = C // n_heads

    def ln(v, w, b):
        mu = v.mean(-1, keepdims=True)
        var = ((v - mu) ** 2).mean(-1, keepdims=True)
        return (v - mu) / jnp.sqrt(var + EPS) * w + b

    h = ln(x, params["ln1_w"], params["ln1_b"])
    q = h @ params["wq"]
    k = h @ params["wk"]
    v = h @ params["wv"]
    q = q.reshape(B, S, n_heads, dh).transpose(0, 2, 1, 3)
    k = k.reshape(B, S, n_heads, dh).transpose(0, 2, 1, 3)
    v = v.reshape(B, S, n_heads, dh).transpose(0, 2, 1, 3)
    s = jnp.einsum("bhqd,bhkd->bhqk", q, k) / math.sqrt(dh)
    p = jax.nn.softmax(s, axis=-1)
    a = jnp.einsum("bhqk,bhkd->bhqd", p, v).transpose(0, 2, 1, 3).reshape(B, S, C)
    a = a @ params["wo"]
    x1 = x + a
    h2 = ln(x1, params["ln2_w"], params["ln2_b"])
    m1 = h2 @ params["w1"] + params["b1"]
    g = 0.5 * m1 * (1.0 + jax.lax.erf(m1 / math.sqrt(2.0)))
    m2 = g @ params["w2"] + params["b2"]
    return x1 + m2 if params["w2"].shape[1] == C else m2


def make_params(key, C, n_heads, scale=4):
    mid = scale * C
    ks = jax.random.split(key, 8)

    def kaiming(k, fan_in, shape):
        return jax.random.normal(k, shape, jnp.float32) * math.sqrt(2.0 / fan_in)

    # All linear weights stored transposed to (in, out) so kernels compute
    # x @ W directly (PyTorch stores (out, in)).
    return {
        "ln1_w": jnp.ones((1, C), jnp.float32),
        "ln1_b": jnp.zeros((1, C), jnp.float32),
        "wq": kaiming(ks[0], C, (C, C)),
        "wk": kaiming(ks[1], C, (C, C)),
        "wv": kaiming(ks[2], C, (C, C)),
        "wo": kaiming(ks[3], C, (C, C)),
        "ln2_w": jnp.ones((1, C), jnp.float32),
        "ln2_b": jnp.zeros((1, C), jnp.float32),
        "w1": kaiming(ks[4], C, (C, mid)),
        "b1": jnp.zeros((1, mid), jnp.float32),
        "w2": kaiming(ks[5], mid, (mid, C)),
        "b2": jnp.zeros((1, C), jnp.float32),
    }


if __name__ == "__main__":
    B, S, C, H = 2, 8, 32, 8
    key = jax.random.PRNGKey(0)
    kx, kp = jax.random.split(key)
    x = jax.random.normal(kx, (B, S, C), jnp.float32)
    params = make_params(kp, C, H)

    out = transformer_block_self(x, params, n_heads=H)
    out = jax.block_until_ready(out)

    ref = reference(x, params, n_heads=H)
    assert out.shape == ref.shape == (B, S, C)
    err = float(jnp.max(jnp.abs(out - ref)))
    ref_scale = float(jnp.max(jnp.abs(ref))) + 1e-6
    # bf16 MXU operands + approx reciprocal -> looser tolerance than fp32 parity.
    assert err / ref_scale < 5e-2, (err, ref_scale)
    print("KERNEL_OK")
</pallas_src>

<mosaic_0001>
module attributes {stable_mosaic.version = 11 : i64} {
  func.func @qkv_proj_kernel(%arg0: i32, %arg1: i32, %arg2: memref<1x8x32xf32, #tpu.memory_space<vmem>>, %arg3: memref<1x32xf32, #tpu.memory_space<vmem>>, %arg4: memref<1x32xf32, #tpu.memory_space<vmem>>, %arg5: memref<32x32xbf16, #tpu.memory_space<vmem>>, %arg6: memref<32x32xbf16, #tpu.memory_space<vmem>>, %arg7: memref<32x32xbf16, #tpu.memory_space<vmem>>, %arg8: memref<1x8x32xbf16, #tpu.memory_space<vmem>>, %arg9: memref<1x8x32xbf16, #tpu.memory_space<vmem>>, %arg10: memref<1x8x32xbf16, #tpu.memory_space<vmem>>) attributes {dimension_semantics = [#tpu.dimension_semantics<parallel>, #tpu.dimension_semantics<parallel>], iteration_bounds = array<i64: 2, 1>, scalar_prefetch = 0 : i64, scratch_operands = 0 : i64, tpu.core_type = #tpu.core_type<tc>, window_params = [{transform_indices = @transform_0, window_bounds = array<i64: 1, 8, 32>}, {pipeline_mode = #tpu.pipeline_mode<synchronous>, transform_indices = @transform_1, window_bounds = array<i64: 1, 32>}, {pipeline_mode = #tpu.pipeline_mode<synchronous>, transform_indices = @transform_2, window_bounds = array<i64: 1, 32>}, {pipeline_mode = #tpu.pipeline_mode<synchronous>, transform_indices = @transform_3, window_bounds = array<i64: 32, 32>}, {pipeline_mode = #tpu.pipeline_mode<synchronous>, transform_indices = @transform_4, window_bounds = array<i64: 32, 32>}, {pipeline_mode = #tpu.pipeline_mode<synchronous>, transform_indices = @transform_5, window_bounds = array<i64: 32, 32>}, {transform_indices = @transform_6, window_bounds = array<i64: 1, 8, 32>}, {transform_indices = @transform_7, window_bounds = array<i64: 1, 8, 32>}, {transform_indices = @transform_8, window_bounds = array<i64: 1, 8, 32>}]} {
    %c0 = arith.constant 0 : index
    %c0_0 = arith.constant 0 : index
    %c0_1 = arith.constant 0 : index
    %0 = vector.load %arg2[%c0, %c0_0, %c0_1] : memref<1x8x32xf32, #tpu.memory_space<vmem>>, vector<1x8x32xf32>
    %1 = vector.shape_cast %0 : vector<1x8x32xf32> to vector<8x32xf32>
    %c0_2 = arith.constant 0 : index
    %c0_3 = arith.constant 0 : index
    %2 = vector.load %arg3[%c0_2, %c0_3] : memref<1x32xf32, #tpu.memory_space<vmem>>, vector<1x32xf32>
    %c0_4 = arith.constant 0 : index
    %c0_5 = arith.constant 0 : index
    %3 = vector.load %arg4[%c0_4, %c0_5] : memref<1x32xf32, #tpu.memory_space<vmem>>, vector<1x32xf32>
    %cst = arith.constant dense<0.000000e+00> : vector<8xf32>
    %4 = vector.multi_reduction <add>, %1, %cst [1] : vector<8x32xf32> to vector<8xf32>
    %5 = vector.shape_cast %4 : vector<8xf32> to vector<8x1xf32>
    %cst_6 = arith.constant 3.200000e+01 : f32
    %6 = vector.broadcast %cst_6 : f32 to vector<8x1xf32>
    %7 = arith.divf %5, %6 : vector<8x1xf32>
    %8 = vector.broadcast %7 : vector<8x1xf32> to vector<8x32xf32>
    %9 = arith.subf %1, %8 : vector<8x32xf32>
    %10 = arith.mulf %9, %9 : vector<8x32xf32>
    %cst_7 = arith.constant dense<0.000000e+00> : vector<8xf32>
    %11 = vector.multi_reduction <add>, %10, %cst_7 [1] : vector<8x32xf32> to vector<8xf32>
    %12 = vector.shape_cast %11 : vector<8xf32> to vector<8x1xf32>
    %cst_8 = arith.constant 3.200000e+01 : f32
    %13 = vector.broadcast %cst_8 : f32 to vector<8x1xf32>
    %14 = arith.divf %12, %13 : vector<8x1xf32>
    %15 = vector.broadcast %7 : vector<8x1xf32> to vector<8x32xf32>
    %16 = arith.subf %1, %15 : vector<8x32xf32>
    %cst_9 = arith.constant 9.99999974E-6 : f32
    %17 = vector.broadcast %cst_9 : f32 to vector<8x1xf32>
    %18 = arith.addf %14, %17 : vector<8x1xf32>
    %19 = math.rsqrt %18 : vector<8x1xf32>
    %20 = vector.broadcast %19 : vector<8x1xf32> to vector<8x32xf32>
    %21 = arith.mulf %16, %20 : vector<8x32xf32>
    %22 = vector.broadcast %2 : vector<1x32xf32> to vector<8x32xf32>
    %23 = arith.mulf %21, %22 : vector<8x32xf32>
    %24 = vector.broadcast %3 : vector<1x32xf32> to vector<8x32xf32>
    %25 = arith.addf %23, %24 : vector<8x32xf32>
    %26 = arith.truncf %25 : vector<8x32xf32> to vector<8x32xbf16>
    %c0_10 = arith.constant 0 : index
    %c0_11 = arith.constant 0 : index
    %27 = vector.load %arg5[%c0_10, %c0_11] : memref<32x32xbf16, #tpu.memory_space<vmem>>, vector<32x32xbf16>
    %cst_12 = arith.constant dense<0.000000e+00> : vector<8x32xf32>
    %28 = tpu.matmul %26, %27, %cst_12 {dimension_numbers = #tpu.dot_dimension_numbers<[1], [0], [0], [1], [0, 0, 1, 1], [], []>} : vector<8x32xbf16>, vector<32x32xbf16>, vector<8x32xf32> -> vector<8x32xf32>
    %cst_13 = arith.constant 5.000000e-01 : f32
    %29 = vector.broadcast %cst_13 : f32 to vector<8x32xf32>
    %30 = arith.mulf %28, %29 : vector<8x32xf32>
    %c0_14 = arith.constant 0 : index
    %c0_15 = arith.constant 0 : index
    %31 = vector.load %arg6[%c0_14, %c0_15] : memref<32x32xbf16, #tpu.memory_space<vmem>>, vector<32x32xbf16>
    %cst_16 = arith.constant dense<0.000000e+00> : vector<8x32xf32>
    %32 = tpu.matmul %26, %31, %cst_16 {dimension_numbers = #tpu.dot_dimension_numbers<[1], [0], [0], [1], [0, 0, 1, 1], [], []>} : vector<8x32xbf16>, vector<32x32xbf16>, vector<8x32xf32> -> vector<8x32xf32>
    %c0_17 = arith.constant 0 : index
    %c0_18 = arith.constant 0 : index
    %33 = vector.load %arg7[%c0_17, %c0_18] : memref<32x32xbf16, #tpu.memory_space<vmem>>, vector<32x32xbf16>
    %cst_19 = arith.constant dense<0.000000e+00> : vector<8x32xf32>
    %34 = tpu.matmul %26, %33, %cst_19 {dimension_numbers = #tpu.dot_dimension_numbers<[1], [0], [0], [1], [0, 0, 1, 1], [], []>} : vector<8x32xbf16>, vector<32x32xbf16>, vector<8x32xf32> -> vector<8x32xf32>
    %35 = arith.truncf %30 : vector<8x32xf32> to vector<8x32xbf16>
    %c0_20 = arith.constant 0 : index
    %c0_21 = arith.constant 0 : index
    %c0_22 = arith.constant 0 : index
    %36 = vector.load %arg8[%c0_20, %c0_21, %c0_22] : memref<1x8x32xbf16, #tpu.memory_space<vmem>>, vector<1x8x32xbf16>
    %37 = vector.shape_cast %36 : vector<1x8x32xbf16> to vector<8x32xbf16>
    %38 = vector.shape_cast %35 : vector<8x32xbf16> to vector<1x8x32xbf16>
    tpu.vector_store %arg8[%c0_20, %c0_21, %c0_22], %38 {strides = array<i32>} : memref<1x8x32xbf16, #tpu.memory_space<vmem>>, vector<1x8x32xbf16>,
    %39 = arith.truncf %32 : vector<8x32xf32> to vector<8x32xbf16>
    %c0_23 = arith.constant 0 : index
    %c0_24 = arith.constant 0 : index
    %c0_25 = arith.constant 0 : index
    %40 = vector.load %arg9[%c0_23, %c0_24, %c0_25] : memref<1x8x32xbf16, #tpu.memory_space<vmem>>, vector<1x8x32xbf16>
    %41 = vector.shape_cast %40 : vector<1x8x32xbf16> to vector<8x32xbf16>
    %42 = vector.shape_cast %39 : vector<8x32xbf16> to vector<1x8x32xbf16>
    tpu.vector_store %arg9[%c0_23, %c0_24, %c0_25], %42 {strides = array<i32>} : memref<1x8x32xbf16, #tpu.memory_space<vmem>>, vector<1x8x32xbf16>,
    %43 = arith.truncf %34 : vector<8x32xf32> to vector<8x32xbf16>
    %c0_26 = arith.constant 0 : index
    %c0_27 = arith.constant 0 : index
    %c0_28 = arith.constant 0 : index
    %44 = vector.load %arg10[%c0_26, %c0_27, %c0_28] : memref<1x8x32xbf16, #tpu.memory_space<vmem>>, vector<1x8x32xbf16>
    %45 = vector.shape_cast %44 : vector<1x8x32xbf16> to vector<8x32xbf16>
    %46 = vector.shape_cast %43 : vector<8x32xbf16> to vector<1x8x32xbf16>
    tpu.vector_store %arg10[%c0_26, %c0_27, %c0_28], %46 {strides = array<i32>} : memref<1x8x32xbf16, #tpu.memory_space<vmem>>, vector<1x8x32xbf16>,
    return
  }
  func.func @transform_0(%arg0: i32, %arg1: i32) -> (i32, i32, i32) {
    %c0_i32 = arith.constant 0 : i32
    %c0_i32_0 = arith.constant 0 : i32
    return %arg0, %arg1, %c0_i32 : i32, i32, i32
  }
  func.func @transform_1(%arg0: i32, %arg1: i32) -> (i32, i32) {
    %c0_i32 = arith.constant 0 : i32
    %c0_i32_0 = arith.constant 0 : i32
    %c0_i32_1 = arith.constant 0 : i32
    return %c0_i32, %c0_i32_0 : i32, i32
  }
  func.func @transform_2(%arg0: i32, %arg1: i32) -> (i32, i32) {
    %c0_i32 = arith.constant 0 : i32
    %c0_i32_0 = arith.constant 0 : i32
    %c0_i32_1 = arith.constant 0 : i32
    return %c0_i32, %c0_i32_0 : i32, i32
  }
  func.func @transform_3(%arg0: i32, %arg1: i32) -> (i32, i32) {
    %c0_i32 = arith.constant 0 : i32
    %c0_i32_0 = arith.constant 0 : i32
    %c0_i32_1 = arith.constant 0 : i32
    return %c0_i32, %c0_i32_0 : i32, i32
  }
  func.func @transform_4(%arg0: i32, %arg1: i32) -> (i32, i32) {
    %c0_i32 = arith.constant 0 : i32
    %c0_i32_0 = arith.constant 0 : i32
    %c0_i32_1 = arith.constant 0 : i32
    return %c0_i32, %c0_i32_0 : i32, i32
  }
  func.func @transform_5(%arg0: i32, %arg1: i32) -> (i32, i32) {
    %c0_i32 = arith.constant 0 : i32
    %c0_i32_0 = arith.constant 0 : i32
    %c0_i32_1 = arith.constant 0 : i32
    return %c0_i32, %c0_i32_0 : i32, i32
  }
  func.func @transform_6(%arg0: i32, %arg1: i32) -> (i32, i32, i32) {
    %c0_i32 = arith.constant 0 : i32
    %c0_i32_0 = arith.constant 0 : i32
    return %arg0, %arg1, %c0_i32 : i32, i32, i32
  }
  func.func @transform_7(%arg0: i32, %arg1: i32) -> (i32, i32, i32) {
    %c0_i32 = arith.constant 0 : i32
    %c0_i32_0 = arith.constant 0 : i32
    return %arg0, %arg1, %c0_i32 : i32, i32, i32
  }
  func.func @transform_8(%arg0: i32, %arg1: i32) -> (i32, i32, i32) {
    %c0_i32 = arith.constant 0 : i32
    %c0_i32_0 = arith.constant 0 : i32
    return %arg0, %arg1, %c0_i32 : i32, i32, i32
  }
}

module attributes {stable_mosaic.version = 11 : i64} {
  func.func @qkv_proj_kernel(%arg0: i32, %arg1: i32, %arg2: memref<1x8x32xf32, #tpu.memory_space<vmem>>, %arg3: memref<1x32xf32, #tpu.memory_space<vmem>>, %arg4: memref<1x32xf32, #tpu.memory_space<vmem>>, %arg5: memref<32x32xbf16, #tpu.memory_space<vmem>>, %arg6: memref<32x32xbf16, #tpu.memory_space<vmem>>, %arg7: memref<32x32xbf16, #tpu.memory_space<vmem>>, %arg8: memref<1x8x32xbf16, #tpu.memory_space<vmem>>, %arg9: memref<1x8x32xbf16, #tpu.memory_space<vmem>>, %arg10: memref<1x8x32xbf16, #tpu.memory_space<vmem>>) attributes {dimension_semantics = [#tpu.dimension_semantics<parallel>, #tpu.dimension_semantics<parallel>], iteration_bounds = array<i64: 2, 1>, scalar_prefetch = 0 : i64, scratch_operands = 0 : i64, tpu.core_type = #tpu.core_type<tc>, window_params = [{transform_indices = @transform_0, window_bounds = array<i64: 1, 8, 32>}, {pipeline_mode = #tpu.pipeline_mode<synchronous>, transform_indices = @transform_1, window_bounds = array<i64: 1, 32>}, {pipeline_mode = #tpu.pipeline_mode<synchronous>, transform_indices = @transform_2, window_bounds = array<i64: 1, 32>}, {pipeline_mode = #tpu.pipeline_mode<synchronous>, transform_indices = @transform_3, window_bounds = array<i64: 32, 32>}, {pipeline_mode = #tpu.pipeline_mode<synchronous>, transform_indices = @transform_4, window_bounds = array<i64: 32, 32>}, {pipeline_mode = #tpu.pipeline_mode<synchronous>, transform_indices = @transform_5, window_bounds = array<i64: 32, 32>}, {transform_indices = @transform_6, window_bounds = array<i64: 1, 8, 32>}, {transform_indices = @transform_7, window_bounds = array<i64: 1, 8, 32>}, {transform_indices = @transform_8, window_bounds = array<i64: 1, 8, 32>}]} {
    %c0 = arith.constant 0 : index
    %c0_0 = arith.constant 0 : index
    %c0_1 = arith.constant 0 : index
    %0 = vector.load %arg2[%c0, %c0_0, %c0_1] : memref<1x8x32xf32, #tpu.memory_space<vmem>>, vector<1x8x32xf32>
    %1 = vector.shape_cast %0 : vector<1x8x32xf32> to vector<8x32xf32>
    %c0_2 = arith.constant 0 : index
    %c0_3 = arith.constant 0 : index
    %2 = vector.load %arg3[%c0_2, %c0_3] : memref<1x32xf32, #tpu.memory_space<vmem>>, vector<1x32xf32>
    %c0_4 = arith.constant 0 : index
    %c0_5 = arith.constant 0 : index
    %3 = vector.load %arg4[%c0_4, %c0_5] : memref<1x32xf32, #tpu.memory_space<vmem>>, vector<1x32xf32>
    %cst = arith.constant dense<0.000000e+00> : vector<8xf32>
    %4 = vector.multi_reduction <add>, %1, %cst [1] : vector<8x32xf32> to vector<8xf32>
    %5 = vector.shape_cast %4 : vector<8xf32> to vector<8x1xf32>
    %cst_6 = arith.constant 3.200000e+01 : f32
    %6 = vector.broadcast %cst_6 : f32 to vector<8x1xf32>
    %7 = arith.divf %5, %6 : vector<8x1xf32>
    %8 = vector.broadcast %7 : vector<8x1xf32> to vector<8x32xf32>
    %9 = arith.subf %1, %8 : vector<8x32xf32>
    %10 = arith.mulf %9, %9 : vector<8x32xf32>
    %cst_7 = arith.constant dense<0.000000e+00> : vector<8xf32>
    %11 = vector.multi_reduction <add>, %10, %cst_7 [1] : vector<8x32xf32> to vector<8xf32>
    %12 = vector.shape_cast %11 : vector<8xf32> to vector<8x1xf32>
    %cst_8 = arith.constant 3.200000e+01 : f32
    %13 = vector.broadcast %cst_8 : f32 to vector<8x1xf32>
    %14 = arith.divf %12, %13 : vector<8x1xf32>
    %15 = vector.broadcast %7 : vector<8x1xf32> to vector<8x32xf32>
    %16 = arith.subf %1, %15 : vector<8x32xf32>
    %cst_9 = arith.constant 9.99999974E-6 : f32
    %17 = vector.broadcast %cst_9 : f32 to vector<8x1xf32>
    %18 = arith.addf %14, %17 : vector<8x1xf32>
    %19 = math.rsqrt %18 : vector<8x1xf32>
    %20 = vector.broadcast %19 : vector<8x1xf32> to vector<8x32xf32>
    %21 = arith.mulf %16, %20 : vector<8x32xf32>
    %22 = vector.broadcast %2 : vector<1x32xf32> to vector<8x32xf32>
    %23 = arith.mulf %21, %22 : vector<8x32xf32>
    %24 = vector.broadcast %3 : vector<1x32xf32> to vector<8x32xf32>
    %25 = arith.addf %23, %24 : vector<8x32xf32>
    %26 = arith.truncf %25 : vector<8x32xf32> to vector<8x32xbf16>
    %c0_10 = arith.constant 0 : index
    %c0_11 = arith.constant 0 : index
    %27 = vector.load %arg5[%c0_10, %c0_11] : memref<32x32xbf16, #tpu.memory_space<vmem>>, vector<32x32xbf16>
    %cst_12 = arith.constant dense<0.000000e+00> : vector<8x32xf32>
    %28 = tpu.matmul %26, %27, %cst_12 {dimension_numbers = #tpu.dot_dimension_numbers<[1], [0], [0], [1], [0, 0, 1, 1], [], []>} : vector<8x32xbf16>, vector<32x32xbf16>, vector<8x32xf32> -> vector<8x32xf32>
    %cst_13 = arith.constant 5.000000e-01 : f32
    %29 = vector.broadcast %cst_13 : f32 to vector<8x32xf32>
    %30 = arith.mulf %28, %29 : vector<8x32xf32>
    %c0_14 = arith.constant 0 : index
    %c0_15 = arith.constant 0 : index
    %31 = vector.load %arg6[%c0_14, %c0_15] : memref<32x32xbf16, #tpu.memory_space<vmem>>, vector<32x32xbf16>
    %cst_16 = arith.constant dense<0.000000e+00> : vector<8x32xf32>
    %32 = tpu.matmul %26, %31, %cst_16 {dimension_numbers = #tpu.dot_dimension_numbers<[1], [0], [0], [1], [0, 0, 1, 1], [], []>} : vector<8x32xbf16>, vector<32x32xbf16>, vector<8x32xf32> -> vector<8x32xf32>
    %c0_17 = arith.constant 0 : index
    %c0_18 = arith.constant 0 : index
    %33 = vector.load %arg7[%c0_17, %c0_18] : memref<32x32xbf16, #tpu.memory_space<vmem>>, vector<32x32xbf16>
    %cst_19 = arith.constant dense<0.000000e+00> : vector<8x32xf32>
    %34 = tpu.matmul %26, %33, %cst_19 {dimension_numbers = #tpu.dot_dimension_numbers<[1], [0], [0], [1], [0, 0, 1, 1], [], []>} : vector<8x32xbf16>, vector<32x32xbf16>, vector<8x32xf32> -> vector<8x32xf32>
    %35 = arith.truncf %30 : vector<8x32xf32> to vector<8x32xbf16>
    %c0_20 = arith.constant 0 : index
    %c0_21 = arith.constant 0 : index
    %c0_22 = arith.constant 0 : index
    %36 = vector.load %arg8[%c0_20, %c0_21, %c0_22] : memref<1x8x32xbf16, #tpu.memory_space<vmem>>, vector<1x8x32xbf16>
    %37 = vector.shape_cast %36 : vector<1x8x32xbf16> to vector<8x32xbf16>
    %38 = vector.shape_cast %35 : vector<8x32xbf16> to vector<1x8x32xbf16>
    tpu.vector_store %arg8[%c0_20, %c0_21, %c0_22], %38 {strides = array<i32>} : memref<1x8x32xbf16, #tpu.memory_space<vmem>>, vector<1x8x32xbf16>,
    %39 = arith.truncf %32 : vector<8x32xf32> to vector<8x32xbf16>
    %c0_23 = arith.constant 0 : index
    %c0_24 = arith.constant 0 : index
    %c0_25 = arith.constant 0 : index
    %40 = vector.load %arg9[%c0_23, %c0_24, %c0_25] : memref<1x8x32xbf16, #tpu.memory_space<vmem>>, vector<1x8x32xbf16>
    %41 = vector.shape_cast %40 : vector<1x8x32xbf16> to vector<8x32xbf16>
    %42 = vector.shape_cast %39 : vector<8x32xbf16> to vector<1x8x32xbf16>
    tpu.vector_store %arg9[%c0_23, %c0_24, %c0_25], %42 {strides = array<i32>} : memref<1x8x32xbf16, #tpu.memory_space<vmem>>, vector<1x8x32xbf16>,
    %43 = arith.truncf %34 : vector<8x32xf32> to vector<8x32xbf16>
    %c0_26 = arith.constant 0 : index
    %c0_27 = arith.constant 0 : index
    %c0_28 = arith.constant 0 : index
    %44 = vector.load %arg10[%c0_26, %c0_27, %c0_28] : memref<1x8x32xbf16, #tpu.memory_space<vmem>>, vector<1x8x32xbf16>
    %45 = vector.shape_cast %44 : vector<1x8x32xbf16> to vector<8x32xbf16>
    %46 = vector.shape_cast %43 : vector<8x32xbf16> to vector<1x8x32xbf16>
    tpu.vector_store %arg10[%c0_26, %c0_27, %c0_28], %46 {strides = array<i32>} : memref<1x8x32xbf16, #tpu.memory_space<vmem>>, vector<1x8x32xbf16>,
    return
  }
  func.func @transform_0(%arg0: i32, %arg1: i32) -> (i32, i32, i32) {
    %c0_i32 = arith.constant 0 : i32
    %c0_i32_0 = arith.constant 0 : i32
    return %arg0, %arg1, %c0_i32 : i32, i32, i32
  }
  func.func @transform_1(%arg0: i32, %arg1: i32) -> (i32, i32) {
    %c0_i32 = arith.constant 0 : i32
    %c0_i32_0 = arith.constant 0 : i32
    %c0_i32_1 = arith.constant 0 : i32
    return %c0_i32, %c0_i32_0 : i32, i32
  }
  func.func @transform_2(%arg0: i32, %arg1: i32) -> (i32, i32) {
    %c0_i32 = arith.constant 0 : i32
    %c0_i32_0 = arith.constant 0 : i32
    %c0_i32_1 = arith.constant 0 : i32
    return %c0_i32, %c0_i32_0 : i32, i32
  }
  func.func @transform_3(%arg0: i32, %arg1: i32) -> (i32, i32) {
    %c0_i32 = arith.constant 0 : i32
    %c0_i32_0 = arith.constant 0 : i32
    %c0_i32_1 = arith.constant 0 : i32
    return %c0_i32, %c0_i32_0 : i32, i32
  }
  func.func @transform_4(%arg0: i32, %arg1: i32) -> (i32, i32) {
    %c0_i32 = arith.constant 0 : i32
    %c0_i32_0 = arith.constant 0 : i32
    %c0_i32_1 = arith.constant 0 : i32
    return %c0_i32, %c0_i32_0 : i32, i32
  }
  func.func @transform_5(%arg0: i32, %arg1: i32) -> (i32, i32) {
    %c0_i32 = arith.constant 0 : i32
    %c0_i32_0 = arith.constant 0 : i32
    %c0_i32_1 = arith.constant 0 : i32
    return %c0_i32, %c0_i32_0 : i32, i32
  }
  func.func @transform_6(%arg0: i32, %arg1: i32) -> (i32, i32, i32) {
    %c0_i32 = arith.constant 0 : i32
    %c0_i32_0 = arith.constant 0 : i32
    return %arg0, %arg1, %c0_i32 : i32, i32, i32
  }
  func.func @transform_7(%arg0: i32, %arg1: i32) -> (i32, i32, i32) {
    %c0_i32 = arith.constant 0 : i32
    %c0_i32_0 = arith.constant 0 : i32
    return %arg0, %arg1, %c0_i32 : i32, i32, i32
  }
  func.func @transform_8(%arg0: i32, %arg1: i32) -> (i32, i32, i32) {
    %c0_i32 = arith.constant 0 : i32
    %c0_i32_0 = arith.constant 0 : i32
    return %arg0, %arg1, %c0_i32 : i32, i32, i32
  }
}

</mosaic_0001>

<bundles_post_ra>
// kernel: tpu_custom_call.1
= control target key start
LH: loop header
LB: loop body
LE: loop exit
PB: predicated region body
PF: predicated region fallthrough
CT: control target
= control target key end

     0   :  { %s1588_s0 = inlined_call_operand.hbm [shape: f32[2,8,32], index: 0, kind: input, shape index: {}]   ;;  %s1589_s1 = inlined_call_operand.hbm [shape: f32[1,32], index: 1, kind: input, shape index: {}]   ;;  %s1590_s2 = inlined_call_operand.vmem [shape: f32[1,32], index: 2, kind: input, shape index: {}]   ;;  %s1591_s3 = inlined_call_operand.hbm [shape: bf16[32,32], index: 3, kind: input, shape index: {}]   ;;  %s1592_s4 = inlined_call_operand.hbm [shape: bf16[32,32], index: 4, kind: input, shape index: {}]   ;;  %s1593_s5 = inlined_call_operand.hbm [shape: bf16[32,32], index: 5, kind: input, shape index: {}]   ;;  %s1594_s6 = inlined_call_operand.hbm [shape: bf16[2,8,32], index: 6, kind: output, shape index: {0}]   ;;  %s1595_s7 = inlined_call_operand.hbm [shape: bf16[2,8,32], index: 7, kind: output, shape index: {1}]   ;;  %s1596_s8 = inlined_call_operand.hbm [shape: bf16[2,8,32], index: 8, kind: output, shape index: {2}]  }
   0x1   :  { %1599 = sst [smem:[#allocation21_spill]] %s1588_s0 }
   0x2   :  { %1600 = sst [smem:[#allocation22_spill]] %s1589_s1 }
   0x3   :  { %1601 = sst [smem:[#allocation23_spill]] %s1590_s2 }
   0x4   :  { %1602 = sst [smem:[#allocation24_spill]] %s1591_s3 }
   0x5   :  { %1603 = sst [smem:[#allocation25_spill]] %s1592_s4 }
   0x6   :  { %14 = vsyncpa [#allocation3], 0 }
   0x7   :  { %16 = vsyncpa [#allocation3 + $0x1], 0 }
   0x8   :  { %17 = vsyncpa [#allocation6], 0 }
   0x9   :  { %18 = vsyncpa [#allocation9], 0 }
   0xa   :  { %19 = vsyncpa [#allocation4], 0 }
   0xb   :  { %21 = vsyncpa [#allocation4 + $0x1], 0 }
   0xc   :  { %22 = vsyncpa [#allocation13], 0 }
   0xd   :  { %24 = vsyncpa [#allocation13 + $0x1], 0  ;;  %s1343_s27 = smov 0   ;;  %s1345_s28 = smov 0  }
   0xe   :  { %s1347_s29 = smov 0   ;;  %s1349_s30 = smov 0  }
   0xf   :  { %s1351_s9 = smov 0   ;;  %s1353_s10 = smov 0  }
  0x10 LB: > { %s1374_s11 = sadd.s32 4294967295, %s1289_s10   ;;  %p809_p0 = scmp.ge.s32.totalorder %s1289_s10, 1  ;;  %s1289_s10 = sphi %s1353_s10, %s30_s10   ;;  %s1285_s9 = sphi %s1351_s9, %s1622_s9   ;;  %s1281_s30 = sphi %s1349_s30, %s1621_s30   ;;  %s1277_s29 = sphi %s1347_s29, %s1620_s29   ;;  %s1273_s28 = sphi %s1345_s28, %s1619_s28   ;;  %s1269_s27 = sphi %s1343_s27, %s1618_s27  }
  0x11   : > { %p65_p1 = scmp.eq.s32.totalorder %s1374_s11, 0  ;;  %p264_p2 = scmp.lt.s32.totalorder %s1289_s10, 3 }
  0x12   : > { %s1604_s1 = sld [smem:[#allocation22_spill]]  ;;  %p814_p4 = scmp.ge.s32.totalorder %s1289_s10, 2 }
  0x13   : > { %p1382_p3 = pnand %p809_p0, %p264_p2  ;;  %s1291_s16 = smov [#allocation5]  }
  0x14   : > { %s278_s17 = sshll.u32 %s1291_s16, 4  ;;  %s1607_s4 = sld [smem:[#allocation25_spill]]  ;;  %s279_s17 = int_to_ptr.vmem [resolvable:$true] %s278_s17 }
  0x15   : > { %p891_p5 = pneg %p1382_p3  ;;  %s1292_s22 = smov [#allocation8]  }
  0x16   : > { %s306_s23 = sshll.u32 %s1292_s22, 4  ;;  %s1608_s3 = sld [smem:[#allocation24_spill]]  ;;  %s307_s23 = int_to_ptr.vmem [resolvable:$true] %s306_s23 }
  0x17   : > { %p1391_p6 = pnand %p891_p5, %p65_p1  ;;  %s1293_s12 = smov 64  }
  0x18   : > { %s276_s14 = sshll.u32 %s1604_s1, 4  ;;  %s1294_s13 = smov 4   ;;  %s277_s14 = int_to_ptr.hbm [resolvable:$true] %s276_s14 }
  0x19   : > { %894 = dma.hbm_to_vmem [thread:$0]  (!%p1391_p6), %s277_s14, 16, %s279_s17, [#allocation6]  }
  0x1a   : > { %s304_s21 = sshll.u32 %s1607_s4, 4  ;;  %s318_s17 = sshll.u32 %s1593_s5, 4  ;;  %s305_s21 = int_to_ptr.hbm [resolvable:$true] %s304_s21  ;;  %s319_s17 = int_to_ptr.hbm [resolvable:$true] %s318_s17 }
  0x1b   : > { %900 = dma.hbm_to_vmem [thread:$0]  (!%p1391_p6), %s305_s21, 256, %s307_s23, [#allocation9], %s1293_s12, %s1293_s12, %s1294_s13  }
  0x1c   : > { %s290_s26 = sshll.u32 %s1608_s3, 4  ;;  %s1295_s19 = smov [#allocation7]   ;;  %s291_s26 = int_to_ptr.hbm [resolvable:$true] %s290_s26 }
  0x1d   : > { %s292_s20 = sshll.u32 %s1295_s19, 4  ;;  %s1296_s22 = smov [#allocation10]   ;;  %s293_s20 = int_to_ptr.vmem [resolvable:$true] %s292_s20 }
  0x1e   : > { %897 = dma.hbm_to_vmem [thread:$0]  (!%p1391_p6), %s291_s26, 256, %s293_s20, [#allocation6], %s1293_s12, %s1293_s12, %s1294_s13  }
  0x1f   : > { %s320_s24 = sshll.u32 %s1296_s22, 4  ;;  %s42_s21 = sadd.s32 1, %s1285_s9  ;;  %s321_s24 = int_to_ptr.vmem [resolvable:$true] %s320_s24 }
  0x20   : > { %903 = dma.hbm_to_vmem [thread:$0]  (!%p1391_p6), %s319_s17, 256, %s321_s24, [#allocation9], %s1293_s12, %s1293_s12, %s1294_s13  }
  0x21   : > { %s1597_s23 = sadd.s32 4294967294, %s1289_s10   ;;  %p44_p7 = scmp.ge.s32.totalorder %s42_s21, 2 }
  0x22   : > { %s51_s25 = sadd.s32 1, %s1277_s29  ;;  %p58_p8 = scmp.ne.s32.totalorder %s1277_s29, %s1273_s28 }
  0x23   : > { %s1624_s21 = smov (%p44_p7, %s42_s21), 0  ;;  %p59_p9 = scmp.eq.s32.totalorder %s1289_s10, 0 }
  0x24   : > { %p64_p10 = scmp.ne.s32.totalorder %s1273_s28, %s1269_s27  ;;  %s46_s26 = ssub.s32 %s1285_s9, %s1624_s21 }
  0x25   : > { %p195_p11 = scmp.eq.s32.totalorder %s1374_s11, 1  ;;  %p49_p12 = scmp.eq.s32.totalorder %s46_s26, 0 }
  0x26   : > { %p1427_p13 = por %p65_p1, %p64_p10  ;;  %p201_p2 = scmp.eq.s32.totalorder %s1597_s23, 1 }
  0x27   : > { %p1431_p0 = por %p195_p11, %p58_p8  ;;  %p60_p5 = por %p59_p9, %p58_p8 }
  0x28   : > { %s1438_s13 = scalar_select %p49_p12, %s1277_s29, %s51_s25  }
  0x29   : > { %p1440_p6 = por %p201_p2, %p64_p10  ;;  %s334_s14 = sand.u32 1, %s1277_s29  }
  0x2a   : > { %s816_s17 = sshll.u32 %s1285_s9, 3  ;;  %p922_p7 = scmp.lt.s32.totalorder %s1289_s10, 2 }
  0x2b   : > { %s815_s19 = sshll.u32 %s334_s14, 3  ;;  %s1612_s0 = sld [smem:[#allocation21_spill]] }
  0x2c   : > { %s338_s1 = scalar_lea.vmem [#allocation2], %s815_s19  ;;  %p905_p11 = pnand %p922_p7, %p60_p5 }
  0x2d   : > { %s347_s3 = sshll.u32 %s338_s1, 4  ;;  %s335_s25 = scalar_lea.sflag [#allocation3], %s334_s14  ;;  %s348_s3 = int_to_ptr.vmem [resolvable:$true] %s347_s3 }
  0x2f   : > { %356 = sbr.rel (%p1382_p3) target bundleno = 490 (0x1ea), region = 44 }
  0x31   : > { %s343_s24 = scalar_lea.hbm %s1612_s0, %s816_s17 }
  0x32   : > { %s345_s26 = sshll.u32 %s343_s24, 4  ;;  %s346_s26 = int_to_ptr.hbm [resolvable:$true] %s345_s26 }
  0x33   : > { %907 = dma.hbm_to_vmem [thread:$0]  (!%p905_p11), %s346_s26, 128, %s348_s3, %s335_s25  }
  0x34   : > { %s1453_s23 = sand.u32 1, %s1273_s28  }
  0x35   : > { %s818_s4 = sshll.u32 %s1453_s23, 3  ;;  %s359_s20 = scalar_lea.sflag [#allocation3], %s1453_s23 }
  0x36   : > { %s362_s17 = scalar_lea.vmem [#allocation2], %s818_s4 }
  0x37   : > { %1248 = dma.done.wait (%p1427_p13), %s359_s20, 128  }
  0x38   : > { %1250 = vsyncadd (%p1427_p13), %s359_s20, 4294967168 }
  0x39   : > { %1252 = dma.done.wait (%p65_p1), [#allocation6], 272  }
  0x3a   : > { %1254 = vsyncadd (%p65_p1), [#allocation6], 4294967024 }
  0x3b   : > { %1256 = dma.done.wait (%p65_p1), [#allocation9], 512  }
  0x3c   : > { %1258 = vsyncadd (%p65_p1), [#allocation9], 4294966784  ;;  %vm430_vm0 = vcmask 261120   ;;  %v427_v0 = vld [vmem:[%s362_s17] sm:$0xff]  ;;  %v1297_v2 = vmov 32.0   ;;  %v861_v17 = vld [vmem:[#allocation7] sm:$0xff] }
  0x3d   : > { %v431_v1 = vsel %vm430_vm0, %v427_v0, 0.0  ;;  %985 = vrcp.f32 %v1297_v2  ;;  %v862_v14 = vld [vmem:[#allocation7 + $0x8] sm:$0xff]  ;;  %v864_v15 = vld [vmem:[#allocation8 + $0x8] sm:$0xff]  ;;  %v863_v18 = vld [vmem:[#allocation8] sm:$0xff]  ;;  %s1613_s2 = sld [smem:[#allocation23_spill]]  ;;  %s1478_s4 = sshll.u32 %s1453_s23, 2 }
  0x3e   : > { %432 = vadd.xlane.f32.xlu0 %v431_v1  ;;  %v866_v16 = vld [vmem:[#allocation10 + $0x8] sm:$0xff]  ;;  %494 = vmatpush.bf16.msra.mxu0 %v862_v14  ;;  %v865_v19 = vld [vmem:[#allocation10] sm:$0xff]  ;;  %v983_v29 = vld [vmem:[#allocation5] ss:$0 sm:$0xff]  ;;  %s1481_s15 = sshll.u32 %s1281_s30, 2  ;;  %s572_s22 = sand.u32 1, %s1374_s11  }
  0x3f   : > { %524 = vmatpush.bf16.msra.mxu1 %v864_v15  ;;  %553 = vmatpush.bf16.msra.mxu2 %v866_v16  ;;  %s604_s19 = scalar_lea.hbm %s1595_s7, %s1481_s15  ;;  %s418_s24 = scalar_lea.vmem [#allocation12], %s1478_s4  ;;  %vm561_vm5 = vcmask 257024  }
  0x40   : > { %s1489_s26 = sshll.u32 %s418_s24, 4  ;;  %s589_s17 = scalar_lea.hbm %s1594_s6, %s1481_s15 }
  0x41   : > { %1614 = sst [smem:[#allocation20_spill]] %s1489_s26  ;;  %s1495_s1 = sshll.u32 %s604_s19, 4  ;;  %s609_s1 = int_to_ptr.hbm [resolvable:$true] %s1495_s1 }
  0x42   : > { %495 = vmatpush.bf16.msra.mxu0 %v861_v17  ;;  %s411_s30 = scalar_lea.vmem [#allocation11], %s1478_s4  ;;  %s1501_s11 = sshll.u32 %s589_s17, 4  ;;  %s594_s11 = int_to_ptr.hbm [resolvable:$true] %s1501_s11 }
  0x43   : > { %v986_v3 = vpop.eup %985  ;;  %525 = vmatpush.bf16.msra.mxu1 %v863_v18  ;;  %554 = vmatpush.bf16.msra.mxu2 %v865_v19  ;;  %v984_v32 = vld [vmem:[%s1613_s2] ss:$0 sm:$0xff]  ;;  %s1499_s3 = sshll.u32 %s411_s30, 4  ;;  %s619_s19 = scalar_lea.hbm %s1596_s8, %s1481_s15  ;;  %s592_s3 = int_to_ptr.vmem [resolvable:$true] %s1499_s3 }
  0x44   : > { %v435_v4 = vmul.f32 32.0, %v986_v3  ;;  %vm439_vm1 = vweird.f32 %v986_v3  ;;  %s1511_s25 = scalar_lea.sflag [#allocation13], %s572_s22  ;;  %s1153_s20 = sshra.s32 %s609_s1, 4  ;;  %s1154_s20 = int_to_ptr.hbm [resolvable:$true] %s1153_s20 }
  0x45   : > { %s1155_s26 = scalar_lea.hbm %s1154_s20, 4  ;;  %s1159_s2 = scalar_lea.hbm %s1595_s7, 8 }
  0x46   : > { %v436_v5 = vsub.f32 1.0, %v435_v4  ;;  %p1156_p1 = scmp.ne.s32.totalorder %s1154_s20, %s1155_s26  ;;  %p1160_p9 = scmp.lt.s32.totalorder %s1154_s20, %s1595_s7 }
  0x47   : > { %p1161_p10 = scmp.lt.s32.totalorder %s1159_s2, %s1155_s26 }
  0x48   : > { %v437_v6 = vmul.f32 %v986_v3, %v436_v5  ;;  %p1157_p3 = pnand %p1156_p1, %p1431_p0 }
  0x49   : > { %p1162_p12 = por %p1161_p10, %p1160_p9 }
  0x4a   : > { %v438_v7 = vadd.f32 %v986_v3, %v437_v6  ;;  %p1158_p8 = pneg %p1157_p3 }
  0x4c   : > { %v440_v8 = vsel %vm439_vm1, %v986_v3, %v438_v7  ;;  %p1163_p13 = pnand %p1162_p12, %p1158_p8 }
  0xb1   : > { %v433_v9 = vpop.xlane.xlu0 %432 }
  0xb2   : > { %v441_v10 = vmul.f32 %v440_v8, %v433_v9 }
  0xb4   : > { %v442_v11 = vsub.f32 %v427_v0, %v441_v10 }
  0xb6   : > { %v443_v12 = vmul.f32 %v442_v11, %v442_v11 }
  0xb8   : > { %v444_v13 = vsel %vm430_vm0, %v443_v12, 0.0 }
  0xb9   : > { %445 = vadd.xlane.f32.xlu0 %v444_v13 }
 0x12c   : > { %v446_v20 = vpop.xlane.xlu0 %445 }
 0x12d   : > { %v447_v21 = vmul.f32 %v446_v20, %v440_v8 }
 0x12f   : > { %v448_v22 = vadd.f32 1e-05, %v447_v21 }
 0x131   : > { %987 = vrsqrt.f32 %v448_v22  ;;  %vm455_vm3 = vweird.f32 %v448_v22 }
 0x137   : > { %v988_v23 = vpop.eup %987 }
 0x138   : > { %v450_v24 = vmul.f32 %v988_v23, %v448_v22  ;;  %vm456_vm2 = vweird.f32 %v988_v23 }
 0x139   : > { %vm457_vm4 = vmor %vm455_vm3, %vm456_vm2 }
 0x13a   : > { %v451_v25 = vmul.f32 %v988_v23, %v450_v24 }
 0x13c   : > { %v452_v26 = vmul.f32 0.5, %v451_v25 }
 0x13e   : > { %v453_v27 = vsub.f32 1.5, %v452_v26 }
 0x140   : > { %v454_v28 = vmul.f32 %v988_v23, %v453_v27 }
 0x142   : > { %v458_v30 = vsel %vm457_vm4, %v988_v23, %v454_v28 }
 0x143   : > { %v459_v31 = vmul.f32 %v458_v30, %v442_v11 }
 0x145   : > { %v463_v33 = vmul.f32 %v983_v29, %v459_v31 }
 0x147   : > { %v467_v34 = vadd.f32 %v984_v32, %v463_v33 }
 0x149   : > { %v468_v35 = vpack.c.bf16 %v467_v34, %v467_v34 }
 0x14b   : > { %834 = vmatmul.msk.bf16.vlgmr.msra.gmra.mxu0 %vm430_vm0, %v468_v35  ;;  %843 = vmatmul.msk.bf16.vlgmr.msra.gmra.mxu1 %vm430_vm0, %v468_v35 }
 0x14c   : > { %852 = vmatmul.msk.bf16.vlgmr.msra.gmra.mxu2 %vm430_vm0, %v468_v35 }
 0x1c8   : > { %v497_v36 = vpop.f32.mrf.mxu0  ;;  %v527_v37 = vpop.f32.mrf.mxu1 }
 0x1c9   : > { %v501_v38 = vmul.f32 0.5, %v497_v36  ;;  %v563_v39 = vpack.c.bf16 %v527_v37, %v527_v37 }
 0x1cb   : > { %v560_v40 = vpack.c.bf16 %v501_v38, %v501_v38  ;;  %564 = vst.msk [vmem:[%s418_s24] sm:$0xf] %vm561_vm5, %v563_v39 }
 0x1cc   : > { %1166 = shalt.err (!%p1163_p13)
}
 0x1cd   : > { %s1615_s22 = sld [smem:[#allocation20_spill]]  ;;  %562 = vst.msk [vmem:[%s411_s30] sm:$0xf] %vm561_vm5, %v560_v40  ;;  %s425_s0 = scalar_lea.vmem [#allocation14], %s1478_s4 }
 0x1ce   : > { %s1528_s14 = sshll.u32 %s425_s0, 4  ;;  %s1530_s20 = sshll.u32 %s619_s19, 4  ;;  %s622_s14 = int_to_ptr.vmem [resolvable:$true] %s1528_s14  ;;  %s624_s20 = int_to_ptr.hbm [resolvable:$true] %s1530_s20 }
 0x1cf   : > { %s568_s2 = scalar_lea.sflag [#allocation4], %s1453_s23  ;;  %s1181_s26 = sshra.s32 %s594_s11, 4  ;;  %s1182_s26 = int_to_ptr.hbm [resolvable:$true] %s1181_s26 }
 0x1d0   : > { %s1183_s17 = scalar_lea.hbm %s1182_s26, 4  ;;  %p1188_p11 = scmp.lt.s32.totalorder %s1182_s26, %s1594_s6 }
 0x1d1   : > { %p1184_p2 = scmp.ne.s32.totalorder %s1182_s26, %s1183_s17 }
 0x1d3   : > { %s1616_s24 = int_to_ptr.vmem [resolvable:$true] %s1615_s22  ;;  %p1185_p5 = pnand %p1184_p2, %p1431_p0 }
 0x1d4   : > { %886 = dma.vmem_to_hbm [thread:$0]  (%p1431_p0), %s1616_s24, 64, %s609_s1, %s1511_s25  }
 0x1d5   : > { %p1186_p7 = pneg %p1185_p5  ;;  %s1187_s1 = scalar_lea.hbm %s1594_s6, 8 }
 0x1d6   : > { %p1189_p1 = scmp.lt.s32.totalorder %s1187_s1, %s1183_s17 }
 0x1d8   : > { %p1190_p3 = por %p1189_p1, %p1188_p11 }
 0x1da   : > { %p1191_p8 = pnand %p1190_p3, %p1186_p7 }
 0x1dc   : > { %1194 = shalt.err (!%p1191_p8)
}
 0x1dd   : > { %885 = dma.vmem_to_hbm [thread:$0]  (%p1431_p0), %s592_s3, 64, %s594_s11, %s568_s2   ;;  %v556_v41 = vpop.f32.mrf.mxu2  ;;  %v499_v43 = vpop.f32.mrf.mxu0 }
 0x1de   : > { %v565_v42 = vpack.c.bf16 %v556_v41, %v556_v41  ;;  %v529_v44 = vpop.f32.mrf.mxu1  ;;  %s1209_s23 = sshra.s32 %s624_s20, 4  ;;  %s1215_s26 = scalar_lea.hbm %s1596_s8, 8  ;;  %s1210_s23 = int_to_ptr.hbm [resolvable:$true] %s1209_s23 }
 0x1df   : > { %s1211_s4 = scalar_lea.hbm %s1210_s23, 4  ;;  %p1216_p13 = scmp.lt.s32.totalorder %s1210_s23, %s1596_s8 }
 0x1e0   : > { %566 = vst.msk [vmem:[%s425_s0] sm:$0xf] %vm561_vm5, %v565_v42  ;;  %p1212_p9 = scmp.ne.s32.totalorder %s1210_s23, %s1211_s4  ;;  %p1217_p2 = scmp.lt.s32.totalorder %s1215_s26, %s1211_s4 }
 0x1e2   : > { %p1213_p10 = pnand %p1212_p9, %p1431_p0  ;;  %p1218_p5 = por %p1217_p2, %p1216_p13 }
 0x1e4   : > { %p1214_p12 = pneg %p1213_p10 }
 0x1e6   : > { %p1219_p7 = pnand %p1218_p5, %p1214_p12 }
 0x1e8   : > { %1222 = shalt.err (!%p1219_p7)
}
 0x1e9   : > { %887 = dma.vmem_to_hbm [thread:$0]  (%p1431_p0), %s622_s14, 64, %s624_s20, %s1511_s25   ;;  %v558_v45 = vpop.f32.mrf.mxu2 }
 0x1ea PF: > { %s635_s0 = sand.u32 1, %s1269_s27   ;;  %p909_p11 = pnand %p814_p4, %p1440_p6 }
 0x1eb   : > { %s636_s2 = scalar_lea.sflag [#allocation4], %s635_s0 }
 0x1ec   : > { %p910_p1 = pneg %p909_p11 }
 0x1ee   : > { %1260 = dma.done.wait (%p910_p1), %s636_s2, 64  }
 0x1ef   : > { %1262 = vsyncadd (%p910_p1), %s636_s2, 4294967232  ;;  %s1617_s17 = sadd.s32 4294967294, %s1289_s10  }
 0x1f0   : > { %s645_s18 = sand.u32 1, %s1617_s17  }
 0x1f1   : > { %s646_s15 = scalar_lea.sflag [#allocation13], %s645_s18 }
 0x1f2   : > { %1264 = dma.done.wait (%p910_p1), %s646_s15, 128  }
 0x1f3   : > { %1266 = vsyncadd (%p910_p1), %s646_s15, 4294967168  ;;  %s30_s10 = sadd.s32 1, %s1289_s10   ;;  %s1618_s27 = smov %s1273_s28 }
 0x1f4   : > { %p27_p0 = scmp.ge.s32.totalorder %s30_s10, 4   ;;  %s1619_s28 = smov %s1277_s29 }
 0x1f5   : > { %s1620_s29 = smov %s1438_s13  ;;  %s1621_s30 = smov %s1285_s9 }
 0x1f6   : > { %s1622_s9 = smov %s1624_s21  ;;  %29 = sbr.rel (!%p27_p0) target bundleno = 16 (0x10), region = 137 }
 0x1fb   :  { %662 = vsyncpa [#allocation3], 1 }
 0x1fc   :  { %664 = vsyncpa [#allocation3 + $0x1], 1 }
 0x1fd   :  { %665 = vsyncpa [#allocation6], 1 }
 0x1fe   :  { %666 = vsyncpa [#allocation9], 1 }
 0x1ff   :  { %667 = vsyncpa [#allocation4], 1 }
 0x200   :  { %669 = vsyncpa [#allocation4 + $0x1], 1 }
 0x201   :  { %670 = vsyncpa [#allocation13], 1 }
 0x202   :  { %672 = vsyncpa [#allocation13 + $0x1], 1 }

// kernel: tpu_custom_call.1
= control target key start
LH: loop header
LB: loop body
LE: loop exit
PB: predicated region body
PF: predicated region fallthrough
CT: control target
= control target key end

     0   :  { %s1588_s0 = inlined_call_operand.hbm [shape: f32[2,8,32], index: 0, kind: input, shape index: {}]   ;;  %s1589_s1 = inlined_call_operand.hbm [shape: f32[1,32], index: 1, kind: input, shape index: {}]   ;;  %s1590_s2 = inlined_call_operand.vmem [shape: f32[1,32], index: 2, kind: input, shape index: {}]   ;;  %s1591_s3 = inlined_call_operand.hbm [shape: bf16[32,32], index: 3, kind: input, shape index: {}]   ;;  %s1592_s4 = inlined_call_operand.hbm [shape: bf16[32,32], index: 4, kind: input, shape index: {}]   ;;  %s1593_s5 = inlined_call_operand.hbm [shape: bf16[32,32], index: 5, kind: input, shape index: {}]   ;;  %s1594_s6 = inlined_call_operand.hbm [shape: bf16[2,8,32], index: 6, kind: output, shape index: {0}]   ;;  %s1595_s7 = inlined_call_operand.hbm [shape: bf16[2,8,32], index: 7, kind: output, shape index: {1}]   ;;  %s1596_s8 = inlined_call_operand.hbm [shape: bf16[2,8,32], index: 8, kind: output, shape index: {2}]  }
   0x1   :  { %1599 = sst [smem:[#allocation21_spill]] %s1588_s0 }
   0x2   :  { %1600 = sst [smem:[#allocation22_spill]] %s1589_s1 }
   0x3   :  { %1601 = sst [smem:[#allocation23_spill]] %s1590_s2 }
   0x4   :  { %1602 = sst [smem:[#allocation24_spill]] %s1591_s3 }
   0x5   :  { %1603 = sst [smem:[#allocation25_spill]] %s1592_s4 }
   0x6   :  { %14 = vsyncpa [#allocation3], 0 }
   0x7   :  { %16 = vsyncpa [#allocation3 + $0x1], 0 }
   0x8   :  { %17 = vsyncpa [#allocation6], 0 }
   0x9   :  { %18 = vsyncpa [#allocation9], 0 }
   0xa   :  { %19 = vsyncpa [#allocation4], 0 }
   0xb   :  { %21 = vsyncpa [#allocation4 + $0x1], 0 }
   0xc   :  { %22 = vsyncpa [#allocation13], 0 }
   0xd   :  { %24 = vsyncpa [#allocation13 + $0x1], 0  ;;  %s1343_s27 = smov 0   ;;  %s1345_s28 = smov 0  }
   0xe   :  { %s1347_s29 = smov 0   ;;  %s1349_s30 = smov 0  }
   0xf   :  { %s1351_s9 = smov 0   ;;  %s1353_s10 = smov 0  }
  0x10 LB: > { %s1374_s11 = sadd.s32 4294967295, %s1289_s10   ;;  %p809_p0 = scmp.ge.s32.totalorder %s1289_s10, 1  ;;  %s1289_s10 = sphi %s1353_s10, %s30_s10   ;;  %s1285_s9 = sphi %s1351_s9, %s1622_s9   ;;  %s1281_s30 = sphi %s1349_s30, %s1621_s30   ;;  %s1277_s29 = sphi %s1347_s29, %s1620_s29   ;;  %s1273_s28 = sphi %s1345_s28, %s1619_s28   ;;  %s1269_s27 = sphi %s1343_s27, %s1618_s27  }
  0x11   : > { %p65_p1 = scmp.eq.s32.totalorder %s1374_s11, 0  ;;  %p264_p2 = scmp.lt.s32.totalorder %s1289_s10, 3 }
  0x12   : > { %s1604_s1 = sld [smem:[#allocation22_spill]]  ;;  %p814_p4 = scmp.ge.s32.totalorder %s1289_s10, 2 }
  0x13   : > { %p1382_p3 = pnand %p809_p0, %p264_p2  ;;  %s1291_s16 = smov [#allocation5]  }
  0x14   : > { %s278_s17 = sshll.u32 %s1291_s16, 4  ;;  %s1607_s4 = sld [smem:[#allocation25_spill]]  ;;  %s279_s17 = int_to_ptr.vmem [resolvable:$true] %s278_s17 }
  0x15   : > { %p891_p5 = pneg %p1382_p3  ;;  %s1292_s22 = smov [#allocation8]  }
  0x16   : > { %s306_s23 = sshll.u32 %s1292_s22, 4  ;;  %s1608_s3 = sld [smem:[#allocation24_spill]]  ;;  %s307_s23 = int_to_ptr.vmem [resolvable:$true] %s306_s23 }
  0x17   : > { %p1391_p6 = pnand %p891_p5, %p65_p1  ;;  %s1293_s12 = smov 64  }
  0x18   : > { %s276_s14 = sshll.u32 %s1604_s1, 4  ;;  %s1294_s13 = smov 4   ;;  %s277_s14 = int_to_ptr.hbm [resolvable:$true] %s276_s14 }
  0x19   : > { %894 = dma.hbm_to_vmem [thread:$0]  (!%p1391_p6), %s277_s14, 16, %s279_s17, [#allocation6]  }
  0x1a   : > { %s304_s21 = sshll.u32 %s1607_s4, 4  ;;  %s318_s17 = sshll.u32 %s1593_s5, 4  ;;  %s305_s21 = int_to_ptr.hbm [resolvable:$true] %s304_s21  ;;  %s319_s17 = int_to_ptr.hbm [resolvable:$true] %s318_s17 }
  0x1b   : > { %900 = dma.hbm_to_vmem [thread:$0]  (!%p1391_p6), %s305_s21, 256, %s307_s23, [#allocation9], %s1293_s12, %s1293_s12, %s1294_s13  }
  0x1c   : > { %s290_s26 = sshll.u32 %s1608_s3, 4  ;;  %s1295_s19 = smov [#allocation7]   ;;  %s291_s26 = int_to_ptr.hbm [resolvable:$true] %s290_s26 }
  0x1d   : > { %s292_s20 = sshll.u32 %s1295_s19, 4  ;;  %s1296_s22 = smov [#allocation10]   ;;  %s293_s20 = int_to_ptr.vmem [resolvable:$true] %s292_s20 }
  0x1e   : > { %897 = dma.hbm_to_vmem [thread:$0]  (!%p1391_p6), %s291_s26, 256, %s293_s20, [#allocation6], %s1293_s12, %s1293_s12, %s1294_s13  }
  0x1f   : > { %s320_s24 = sshll.u32 %s1296_s22, 4  ;;  %s42_s21 = sadd.s32 1, %s1285_s9  ;;  %s321_s24 = int_to_ptr.vmem [resolvable:$true] %s320_s24 }
  0x20   : > { %903 = dma.hbm_to_vmem [thread:$0]  (!%p1391_p6), %s319_s17, 256, %s321_s24, [#allocation9], %s1293_s12, %s1293_s12, %s1294_s13  }
  0x21   : > { %s1597_s23 = sadd.s32 4294967294, %s1289_s10   ;;  %p44_p7 = scmp.ge.s32.totalorder %s42_s21, 2 }
  0x22   : > { %s51_s25 = sadd.s32 1, %s1277_s29  ;;  %p58_p8 = scmp.ne.s32.totalorder %s1277_s29, %s1273_s28 }
  0x23   : > { %s1624_s21 = smov (%p44_p7, %s42_s21), 0  ;;  %p59_p9 = scmp.eq.s32.totalorder %s1289_s10, 0 }
  0x24   : > { %p64_p10 = scmp.ne.s32.totalorder %s1273_s28, %s1269_s27  ;;  %s46_s26 = ssub.s32 %s1285_s9, %s1624_s21 }
  0x25   : > { %p195_p11 = scmp.eq.s32.totalorder %s1374_s11, 1  ;;  %p49_p12 = scmp.eq.s32.totalorder %s46_s26, 0 }
  0x26   : > { %p1427_p13 = por %p65_p1, %p64_p10  ;;  %p201_p2 = scmp.eq.s32.totalorder %s1597_s23, 1 }
  0x27   : > { %p1431_p0 = por %p195_p11, %p58_p8  ;;  %p60_p5 = por %p59_p9, %p58_p8 }
  0x28   : > { %s1438_s13 = scalar_select %p49_p12, %s1277_s29, %s51_s25  }
  0x29   : > { %p1440_p6 = por %p201_p2, %p64_p10  ;;  %s334_s14 = sand.u32 1, %s1277_s29  }
  0x2a   : > { %s816_s17 = sshll.u32 %s1285_s9, 3  ;;  %p922_p7 = scmp.lt.s32.totalorder %s1289_s10, 2 }
  0x2b   : > { %s815_s19 = sshll.u32 %s334_s14, 3  ;;  %s1612_s0 = sld [smem:[#allocation21_spill]] }
  0x2c   : > { %s338_s1 = scalar_lea.vmem [#allocation2], %s815_s19  ;;  %p905_p11 = pnand %p922_p7, %p60_p5 }
  0x2d   : > { %s347_s3 = sshll.u32 %s338_s1, 4  ;;  %s335_s25 = scalar_lea.sflag [#allocation3], %s334_s14  ;;  %s348_s3 = int_to_ptr.vmem [resolvable:$true] %s347_s3 }
  0x2f   : > { %356 = sbr.rel (%p1382_p3) target bundleno = 490 (0x1ea), region = 44 }
  0x31   : > { %s343_s24 = scalar_lea.hbm %s1612_s0, %s816_s17 }
  0x32   : > { %s345_s26 = sshll.u32 %s343_s24, 4  ;;  %s346_s26 = int_to_ptr.hbm [resolvable:$true] %s345_s26 }
  0x33   : > { %907 = dma.hbm_to_vmem [thread:$0]  (!%p905_p11), %s346_s26, 128, %s348_s3, %s335_s25  }
  0x34   : > { %s1453_s23 = sand.u32 1, %s1273_s28  }
  0x35   : > { %s818_s4 = sshll.u32 %s1453_s23, 3  ;;  %s359_s20 = scalar_lea.sflag [#allocation3], %s1453_s23 }
  0x36   : > { %s362_s17 = scalar_lea.vmem [#allocation2], %s818_s4 }
  0x37   : > { %1248 = dma.done.wait (%p1427_p13), %s359_s20, 128  }
  0x38   : > { %1250 = vsyncadd (%p1427_p13), %s359_s20, 4294967168 }
  0x39   : > { %1252 = dma.done.wait (%p65_p1), [#allocation6], 272  }
  0x3a   : > { %1254 = vsyncadd (%p65_p1), [#allocation6], 4294967024 }
  0x3b   : > { %1256 = dma.done.wait (%p65_p1), [#allocation9], 512  }
  0x3c   : > { %1258 = vsyncadd (%p65_p1), [#allocation9], 4294966784  ;;  %vm430_vm0 = vcmask 261120   ;;  %v427_v0 = vld [vmem:[%s362_s17] sm:$0xff]  ;;  %v1297_v2 = vmov 32.0   ;;  %v861_v17 = vld [vmem:[#allocation7] sm:$0xff] }
  0x3d   : > { %v431_v1 = vsel %vm430_vm0, %v427_v0, 0.0  ;;  %985 = vrcp.f32 %v1297_v2  ;;  %v862_v14 = vld [vmem:[#allocation7 + $0x8] sm:$0xff]  ;;  %v864_v15 = vld [vmem:[#allocation8 + $0x8] sm:$0xff]  ;;  %v863_v18 = vld [vmem:[#allocation8] sm:$0xff]  ;;  %s1613_s2 = sld [smem:[#allocation23_spill]]  ;;  %s1478_s4 = sshll.u32 %s1453_s23, 2 }
  0x3e   : > { %432 = vadd.xlane.f32.xlu0 %v431_v1  ;;  %v866_v16 = vld [vmem:[#allocation10 + $0x8] sm:$0xff]  ;;  %494 = vmatpush.bf16.msra.mxu0 %v862_v14  ;;  %v865_v19 = vld [vmem:[#allocation10] sm:$0xff]  ;;  %v983_v29 = vld [vmem:[#allocation5] ss:$0 sm:$0xff]  ;;  %s1481_s15 = sshll.u32 %s1281_s30, 2  ;;  %s572_s22 = sand.u32 1, %s1374_s11  }
  0x3f   : > { %524 = vmatpush.bf16.msra.mxu1 %v864_v15  ;;  %553 = vmatpush.bf16.msra.mxu2 %v866_v16  ;;  %s604_s19 = scalar_lea.hbm %s1595_s7, %s1481_s15  ;;  %s418_s24 = scalar_lea.vmem [#allocation12], %s1478_s4  ;;  %vm561_vm5 = vcmask 257024  }
  0x40   : > { %s1489_s26 = sshll.u32 %s418_s24, 4  ;;  %s589_s17 = scalar_lea.hbm %s1594_s6, %s1481_s15 }
  0x41   : > { %1614 = sst [smem:[#allocation20_spill]] %s1489_s26  ;;  %s1495_s1 = sshll.u32 %s604_s19, 4  ;;  %s609_s1 = int_to_ptr.hbm [resolvable:$true] %s1495_s1 }
  0x42   : > { %495 = vmatpush.bf16.msra.mxu0 %v861_v17  ;;  %s411_s30 = scalar_lea.vmem [#allocation11], %s1478_s4  ;;  %s1501_s11 = sshll.u32 %s589_s17, 4  ;;  %s594_s11 = int_to_ptr.hbm [resolvable:$true] %s1501_s11 }
  0x43   : > { %v986_v3 = vpop.eup %985  ;;  %525 = vmatpush.bf16.msra.mxu1 %v863_v18  ;;  %554 = vmatpush.bf16.msra.mxu2 %v865_v19  ;;  %v984_v32 = vld [vmem:[%s1613_s2] ss:$0 sm:$0xff]  ;;  %s1499_s3 = sshll.u32 %s411_s30, 4  ;;  %s619_s19 = scalar_lea.hbm %s1596_s8, %s1481_s15  ;;  %s592_s3 = int_to_ptr.vmem [resolvable:$true] %s1499_s3 }
  0x44   : > { %v435_v4 = vmul.f32 32.0, %v986_v3  ;;  %vm439_vm1 = vweird.f32 %v986_v3  ;;  %s1511_s25 = scalar_lea.sflag [#allocation13], %s572_s22  ;;  %s1153_s20 = sshra.s32 %s609_s1, 4  ;;  %s1154_s20 = int_to_ptr.hbm [resolvable:$true] %s1153_s20 }
  0x45   : > { %s1155_s26 = scalar_lea.hbm %s1154_s20, 4  ;;  %s1159_s2 = scalar_lea.hbm %s1595_s7, 8 }
  0x46   : > { %v436_v5 = vsub.f32 1.0, %v435_v4  ;;  %p1156_p1 = scmp.ne.s32.totalorder %s1154_s20, %s1155_s26  ;;  %p1160_p9 = scmp.lt.s32.totalorder %s1154_s20, %s1595_s7 }
  0x47   : > { %p1161_p10 = scmp.lt.s32.totalorder %s1159_s2, %s1155_s26 }
  0x48   : > { %v437_v6 = vmul.f32 %v986_v3, %v436_v5  ;;  %p1157_p3 = pnand %p1156_p1, %p1431_p0 }
  0x49   : > { %p1162_p12 = por %p1161_p10, %p1160_p9 }
  0x4a   : > { %v438_v7 = vadd.f32 %v986_v3, %v437_v6  ;;  %p1158_p8 = pneg %p1157_p3 }
  0x4c   : > { %v440_v8 = vsel %vm439_vm1, %v986_v3, %v438_v7  ;;  %p1163_p13 = pnand %p1162_p12, %p1158_p8 }
  0xb1   : > { %v433_v9 = vpop.xlane.xlu0 %432 }
  0xb2   : > { %v441_v10 = vmul.f32 %v440_v8, %v433_v9 }
  0xb4   : > { %v442_v11 = vsub.f32 %v427_v0, %v441_v10 }
  0xb6   : > { %v443_v12 = vmul.f32 %v442_v11, %v442_v11 }
  0xb8   : > { %v444_v13 = vsel %vm430_vm0, %v443_v12, 0.0 }
  0xb9   : > { %445 = vadd.xlane.f32.xlu0 %v444_v13 }
 0x12c   : > { %v446_v20 = vpop.xlane.xlu0 %445 }
 0x12d   : > { %v447_v21 = vmul.f32 %v446_v20, %v440_v8 }
 0x12f   : > { %v448_v22 = vadd.f32 1e-05, %v447_v21 }
 0x131   : > { %987 = vrsqrt.f32 %v448_v22  ;;  %vm455_vm3 = vweird.f32 %v448_v22 }
 0x137   : > { %v988_v23 = vpop.eup %987 }
 0x138   : > { %v450_v24 = vmul.f32 %v988_v23, %v448_v22  ;;  %vm456_vm2 = vweird.f32 %v988_v23 }
 0x139   : > { %vm457_vm4 = vmor %vm455_vm3, %vm456_vm2 }
 0x13a   : > { %v451_v25 = vmul.f32 %v988_v23, %v450_v24 }
 0x13c   : > { %v452_v26 = vmul.f32 0.5, %v451_v25 }
 0x13e   : > { %v453_v27 = vsub.f32 1.5, %v452_v26 }
 0x140   : > { %v454_v28 = vmul.f32 %v988_v23, %v453_v27 }
 0x142   : > { %v458_v30 = vsel %vm457_vm4, %v988_v23, %v454_v28 }
 0x143   : > { %v459_v31 = vmul.f32 %v458_v30, %v442_v11 }
 0x145   : > { %v463_v33 = vmul.f32 %v983_v29, %v459_v31 }
 0x147   : > { %v467_v34 = vadd.f32 %v984_v32, %v463_v33 }
 0x149   : > { %v468_v35 = vpack.c.bf16 %v467_v34, %v467_v34 }
 0x14b   : > { %834 = vmatmul.msk.bf16.vlgmr.msra.gmra.mxu0 %vm430_vm0, %v468_v35  ;;  %843 = vmatmul.msk.bf16.vlgmr.msra.gmra.mxu1 %vm430_vm0, %v468_v35 }
 0x14c   : > { %852 = vmatmul.msk.bf16.vlgmr.msra.gmra.mxu2 %vm430_vm0, %v468_v35 }
 0x1c8   : > { %v497_v36 = vpop.f32.mrf.mxu0  ;;  %v527_v37 = vpop.f32.mrf.mxu1 }
 0x1c9   : > { %v501_v38 = vmul.f32 0.5, %v497_v36  ;;  %v563_v39 = vpack.c.bf16 %v527_v37, %v527_v37 }
 0x1cb   : > { %v560_v40 = vpack.c.bf16 %v501_v38, %v501_v38  ;;  %564 = vst.msk [vmem:[%s418_s24] sm:$0xf] %vm561_vm5, %v563_v39 }
 0x1cc   : > { %1166 = shalt.err (!%p1163_p13)
}
 0x1cd   : > { %s1615_s22 = sld [smem:[#allocation20_spill]]  ;;  %562 = vst.msk [vmem:[%s411_s30] sm:$0xf] %vm561_vm5, %v560_v40  ;;  %s425_s0 = scalar_lea.vmem [#allocation14], %s1478_s4 }
 0x1ce   : > { %s1528_s14 = sshll.u32 %s425_s0, 4  ;;  %s1530_s20 = sshll.u32 %s619_s19, 4  ;;  %s622_s14 = int_to_ptr.vmem [resolvable:$true] %s1528_s14  ;;  %s624_s20 = int_to_ptr.hbm [resolvable:$true] %s1530_s20 }
 0x1cf   : > { %s568_s2 = scalar_lea.sflag [#allocation4], %s1453_s23  ;;  %s1181_s26 = sshra.s32 %s594_s11, 4  ;;  %s1182_s26 = int_to_ptr.hbm [resolvable:$true] %s1181_s26 }
 0x1d0   : > { %s1183_s17 = scalar_lea.hbm %s1182_s26, 4  ;;  %p1188_p11 = scmp.lt.s32.totalorder %s1182_s26, %s1594_s6 }
 0x1d1   : > { %p1184_p2 = scmp.ne.s32.totalorder %s1182_s26, %s1183_s17 }
 0x1d3   : > { %s1616_s24 = int_to_ptr.vmem [resolvable:$true] %s1615_s22  ;;  %p1185_p5 = pnand %p1184_p2, %p1431_p0 }
 0x1d4   : > { %886 = dma.vmem_to_hbm [thread:$0]  (%p1431_p0), %s1616_s24, 64, %s609_s1, %s1511_s25  }
 0x1d5   : > { %p1186_p7 = pneg %p1185_p5  ;;  %s1187_s1 = scalar_lea.hbm %s1594_s6, 8 }
 0x1d6   : > { %p1189_p1 = scmp.lt.s32.totalorder %s1187_s1, %s1183_s17 }
 0x1d8   : > { %p1190_p3 = por %p1189_p1, %p1188_p11 }
 0x1da   : > { %p1191_p8 = pnand %p1190_p3, %p1186_p7 }
 0x1dc   : > { %1194 = shalt.err (!%p1191_p8)
}
 0x1dd   : > { %885 = dma.vmem_to_hbm [thread:$0]  (%p1431_p0), %s592_s3, 64, %s594_s11, %s568_s2   ;;  %v556_v41 = vpop.f32.mrf.mxu2  ;;  %v499_v43 = vpop.f32.mrf.mxu0 }
 0x1de   : > { %v565_v42 = vpack.c.bf16 %v556_v41, %v556_v41  ;;  %v529_v44 = vpop.f32.mrf.mxu1  ;;  %s1209_s23 = sshra.s32 %s624_s20, 4  ;;  %s1215_s26 = scalar_lea.hbm %s1596_s8, 8  ;;  %s1210_s23 = int_to_ptr.hbm [resolvable:$true] %s1209_s23 }
 0x1df   : > { %s1211_s4 = scalar_lea.hbm %s1210_s23, 4  ;;  %p1216_p13 = scmp.lt.s32.totalorder %s1210_s23, %s1596_s8 }
 0x1e0   : > { %566 = vst.msk [vmem:[%s425_s0] sm:$0xf] %vm561_vm5, %v565_v42  ;;  %p1212_p9 = scmp.ne.s32.totalorder %s1210_s23, %s1211_s4  ;;  %p1217_p2 = scmp.lt.s32.totalorder %s1215_s26, %s1211_s4 }
 0x1e2   : > { %p1213_p10 = pnand %p1212_p9, %p1431_p0  ;;  %p1218_p5 = por %p1217_p2, %p1216_p13 }
 0x1e4   : > { %p1214_p12 = pneg %p1213_p10 }
 0x1e6   : > { %p1219_p7 = pnand %p1218_p5, %p1214_p12 }
 0x1e8   : > { %1222 = shalt.err (!%p1219_p7)
}
 0x1e9   : > { %887 = dma.vmem_to_hbm [thread:$0]  (%p1431_p0), %s622_s14, 64, %s624_s20, %s1511_s25   ;;  %v558_v45 = vpop.f32.mrf.mxu2 }
 0x1ea PF: > { %s635_s0 = sand.u32 1, %s1269_s27   ;;  %p909_p11 = pnand %p814_p4, %p1440_p6 }
 0x1eb   : > { %s636_s2 = scalar_lea.sflag [#allocation4], %s635_s0 }
 0x1ec   : > { %p910_p1 = pneg %p909_p11 }
 0x1ee   : > { %1260 = dma.done.wait (%p910_p1), %s636_s2, 64  }
 0x1ef   : > { %1262 = vsyncadd (%p910_p1), %s636_s2, 4294967232  ;;  %s1617_s17 = sadd.s32 4294967294, %s1289_s10  }
 0x1f0   : > { %s645_s18 = sand.u32 1, %s1617_s17  }
 0x1f1   : > { %s646_s15 = scalar_lea.sflag [#allocation13], %s645_s18 }
 0x1f2   : > { %1264 = dma.done.wait (%p910_p1), %s646_s15, 128  }
 0x1f3   : > { %1266 = vsyncadd (%p910_p1), %s646_s15, 4294967168  ;;  %s30_s10 = sadd.s32 1, %s1289_s10   ;;  %s1618_s27 = smov %s1273_s28 }
 0x1f4   : > { %p27_p0 = scmp.ge.s32.totalorder %s30_s10, 4   ;;  %s1619_s28 = smov %s1277_s29 }
 0x1f5   : > { %s1620_s29 = smov %s1438_s13  ;;  %s1621_s30 = smov %s1285_s9 }
 0x1f6   : > { %s1622_s9 = smov %s1624_s21  ;;  %29 = sbr.rel (!%p27_p0) target bundleno = 16 (0x10), region = 137 }
 0x1fb   :  { %662 = vsyncpa [#allocation3], 1 }
 0x1fc   :  { %664 = vsyncpa [#allocation3 + $0x1], 1 }
 0x1fd   :  { %665 = vsyncpa [#allocation6], 1 }
 0x1fe   :  { %666 = vsyncpa [#allocation9], 1 }
 0x1ff   :  { %667 = vsyncpa [#allocation4], 1 }
 0x200   :  { %669 = vsyncpa [#allocation4 + $0x1], 1 }
 0x201   :  { %670 = vsyncpa [#allocation13], 1 }
 0x202   :  { %672 = vsyncpa [#allocation13 + $0x1], 1 }

</bundles_post_ra>
